<compile_context>
chip_gen: v7x
topology: tpu7x:2x2x1
jax: 0.10.0
libtpu: 0.0.40
codegen_flags: <defaults>
</compile_context>

<pallas_src>
import jax
import jax.numpy as jnp
from jax.experimental import pallas as pl
from jax.experimental.pallas import tpu as pltpu


def _round_up(x, m):
    return (x + m - 1) // m * m


def _mlp_kernel(xt_ref, w1t_ref, b1t_ref, w2t_ref, b2t_ref, w3t_ref, b3t_ref, o_ref):
    """Fused 3-layer MLP in transposed (features, batch_tile) layout.

    Batch is on the lane (128) axis -> lane-dense loads/stores.
    MXU matmuls take bf16 inputs with f32 accumulation; tanh runs in f32 (EUP).
    """
    xt = xt_ref[...]                                                 # (insize, TB) bf16
    h1 = jnp.tanh(
        jnp.dot(w1t_ref[...], xt, preferred_element_type=jnp.float32)
        + b1t_ref[...]
    )                                                                # (H1, TB) f32
    h2 = jnp.tanh(
        jnp.dot(w2t_ref[...], h1.astype(jnp.bfloat16),
                preferred_element_type=jnp.float32)
        + b2t_ref[...]
    )                                                                # (H2, TB) f32
    out = (
        jnp.dot(w3t_ref[...], h2.astype(jnp.bfloat16),
                preferred_element_type=jnp.float32)
        + b3t_ref[...]
    )                                                                # (outsize, TB) f32
    o_ref[...] = out.astype(o_ref.dtype)


def controller_predictor_forward_pallas(obs, params, n_seqs, *, tile_b=2048):
    """obs: (..., insize) float32 -> logits (..., n_seqs, 2) via Pallas kernel."""
    w1, b1, w2, b2, w3, b3 = params          # weights stored (in, out); biases (1, out)
    keep_shape = obs.shape[:-1]
    insize = obs.shape[-1]
    h1_dim = w1.shape[1]
    h2_dim = w2.shape[1]
    outsize = w3.shape[1]
    assert outsize == n_seqs * 2, (outsize, n_seqs)

    x = obs.reshape(-1, insize)
    n = x.shape[0]

    # Batch tile on the lane axis: multiple of 128, clamped to the (padded) batch.
    # Per-step VMEM (x tile + out tile, x2 buffers, + resident weights) stays well
    # under the v7x 32 MiB scoped default even at tile_b=4096.
    tile_b = max(128, min(_round_up(tile_b, 128), _round_up(n, 128)))
    n_pad = _round_up(n, tile_b)
    grid = (n_pad // tile_b,)

    # Layout plumbing in the wrapper: pad + transpose the big operand and cast it
    # to bf16 (halves HBM read traffic); weights bf16 (MXU inputs), biases f32.
    xt = jnp.pad(x, ((0, n_pad - n), (0, 0))).T.astype(jnp.bfloat16)   # (insize, n_pad)
    w1t = w1.T.astype(jnp.bfloat16)                                    # (H1, insize)
    w2t = w2.T.astype(jnp.bfloat16)                                    # (H2, H1)
    w3t = w3.T.astype(jnp.bfloat16)                                    # (outsize, H2)
    b1t = b1.T.astype(jnp.float32)                                     # (H1, 1)
    b2t = b2.T.astype(jnp.float32)                                     # (H2, 1)
    b3t = b3.T.astype(jnp.float32)                                     # (outsize, 1)

    def resident(shape):
        # Whole-array block, same block every grid step -> stays VMEM-resident.
        return pl.BlockSpec(shape, lambda i: (0, 0))

    out_t = pl.pallas_call(
        _mlp_kernel,
        out_shape=jax.ShapeDtypeStruct((outsize, n_pad), jnp.float32),
        grid=grid,
        in_specs=[
            pl.BlockSpec((insize, tile_b), lambda i: (0, i)),   # streamed batch tile
            resident((h1_dim, insize)),
            resident((h1_dim, 1)),
            resident((h2_dim, h1_dim)),
            resident((h2_dim, 1)),
            resident((outsize, h2_dim)),
            resident((outsize, 1)),
        ],
        out_specs=pl.BlockSpec((outsize, tile_b), lambda i: (0, i)),
        compiler_params=pltpu.CompilerParams(
            dimension_semantics=("parallel",),   # shard batch tiles across v7x's 2 TCs
        ),
    )(xt, w1t, b1t, w2t, b2t, w3t, b3t)

    logits = out_t[:, :n].T                                            # (n, outsize) f32
    return logits.reshape(*keep_shape, n_seqs, 2)


def _mlp_jnp(x, params):
    w1, b1, w2, b2, w3, b3 = params
    h1 = jnp.tanh(x @ w1 + b1)
    h2 = jnp.tanh(h1 @ w2 + b2)
    return h2 @ w3 + b3


def controller_predictor_forward(obs, params, n_seqs, *, use_pallas=None, tile_b=2048):
    """Dispatcher: tiny batches go to plain jnp/XLA (Pallas launch overhead >> work)."""
    n = 1
    for d in obs.shape[:-1]:
        n *= d
    if use_pallas is None:
        use_pallas = n >= 1024
    if not use_pallas:
        keep_shape = obs.shape[:-1]
        out = _mlp_jnp(obs.reshape(-1, obs.shape[-1]), params)
        return out.reshape(*keep_shape, n_seqs, 2)
    return controller_predictor_forward_pallas(obs, params, n_seqs, tile_b=tile_b)


def init_params(key, insize, hiddens, outsize):
    """Deterministic synthetic init (uniform, like torch default linear init)."""
    sizes = [insize] + list(hiddens) + [outsize]
    params = []
    for i in range(len(sizes) - 1):
        fan_in, fan_out = sizes[i], sizes[i + 1]
        key, kw, kb = jax.random.split(key, 3)
        bound = 1.0 / jnp.sqrt(jnp.float32(fan_in))
        w = jax.random.uniform(kw, (fan_in, fan_out), jnp.float32, -bound, bound)
        b = jax.random.uniform(kb, (1, fan_out), jnp.float32, -bound, bound)
        params += [w, b]
    return tuple(params)


def reference_forward(obs, params, n_seqs, *, mirror_bf16=False):
    """Pure-jnp reference; mirror_bf16=True mirrors the kernel's bf16 MXU inputs."""
    w1, b1, w2, b2, w3, b3 = params
    keep_shape = obs.shape[:-1]
    x = obs.reshape(-1, obs.shape[-1])
    cast = (lambda a: a.astype(jnp.bfloat16)) if mirror_bf16 else (lambda a: a)
    h1 = jnp.tanh(jnp.dot(cast(x), cast(w1), preferred_element_type=jnp.float32) + b1)
    h2 = jnp.tanh(jnp.dot(cast(h1), cast(w2), preferred_element_type=jnp.float32) + b2)
    out = jnp.dot(cast(h2), cast(w3), preferred_element_type=jnp.float32) + b3
    return out.reshape(*keep_shape, n_seqs, 2)


if __name__ == "__main__":
    key = jax.random.PRNGKey(0)

    # Shapes consistent with the module: observation dim 13
    # (pos(3) + quat(4) + linvel(3) + angvel(3)), n_seqs maneuvers, hiddens [32, 32].
    insize = 13
    n_seqs = 5
    outsize = n_seqs * 2
    hiddens = [32, 32]

    key, k_obs, k_obs_small, k_params = jax.random.split(key, 4)
    params = init_params(k_params, insize, hiddens, outsize)

    # Batched path: exercise the Pallas kernel with a multi-tile grid
    # (tile_b=128 -> 3 tiles incl. a padded tail) and a multi-dim leading shape.
    obs = jax.random.normal(k_obs, (3, 100, insize), jnp.float32)      # 300 rows
    logits = controller_predictor_forward(
        obs, params, n_seqs, use_pallas=True, tile_b=128
    )
    logits = jax.block_until_ready(logits)
    assert logits.shape == (3, 100, n_seqs, 2), logits.shape
    ref = reference_forward(obs, params, n_seqs, mirror_bf16=True)
    assert jnp.allclose(logits, ref, atol=1e-2, rtol=1e-2), float(
        jnp.max(jnp.abs(logits - ref))
    )

    # Tiny-batch path: dispatcher falls back to plain jnp (kernel would be pure overhead).
    obs_small = jax.random.normal(k_obs_small, (4, insize), jnp.float32)
    logits_small = controller_predictor_forward(obs_small, params, n_seqs)
    logits_small = jax.block_until_ready(logits_small)
    assert logits_small.shape == (4, n_seqs, 2), logits_small.shape
    ref_small = reference_forward(obs_small, params, n_seqs)
    assert jnp.allclose(logits_small, ref_small, atol=1e-5, rtol=1e-5)

    print("KERNEL_OK")
</pallas_src>

<mosaic_0001>
module attributes {stable_mosaic.version = 11 : i64} {
  func.func @_mlp_kernel(%arg0: i32, %arg1: memref<13x128xbf16, #tpu.memory_space<vmem>>, %arg2: memref<32x13xbf16, #tpu.memory_space<vmem>>, %arg3: memref<32x1xf32, #tpu.memory_space<vmem>>, %arg4: memref<32x32xbf16, #tpu.memory_space<vmem>>, %arg5: memref<32x1xf32, #tpu.memory_space<vmem>>, %arg6: memref<10x32xbf16, #tpu.memory_space<vmem>>, %arg7: memref<10x1xf32, #tpu.memory_space<vmem>>, %arg8: memref<10x128xf32, #tpu.memory_space<vmem>>) attributes {dimension_semantics = [#tpu.dimension_semantics<parallel>], iteration_bounds = array<i64: 3>, scalar_prefetch = 0 : i64, scratch_operands = 0 : i64, tpu.core_type = #tpu.core_type<tc>, window_params = [{transform_indices = @transform_0, window_bounds = array<i64: 13, 128>}, {pipeline_mode = #tpu.pipeline_mode<synchronous>, transform_indices = @transform_1, window_bounds = array<i64: 32, 13>}, {pipeline_mode = #tpu.pipeline_mode<synchronous>, transform_indices = @transform_2, window_bounds = array<i64: 32, 1>}, {pipeline_mode = #tpu.pipeline_mode<synchronous>, transform_indices = @transform_3, window_bounds = array<i64: 32, 32>}, {pipeline_mode = #tpu.pipeline_mode<synchronous>, transform_indices = @transform_4, window_bounds = array<i64: 32, 1>}, {pipeline_mode = #tpu.pipeline_mode<synchronous>, transform_indices = @transform_5, window_bounds = array<i64: 10, 32>}, {pipeline_mode = #tpu.pipeline_mode<synchronous>, transform_indices = @transform_6, window_bounds = array<i64: 10, 1>}, {transform_indices = @transform_7, window_bounds = array<i64: 10, 128>}]} {
    %c0 = arith.constant 0 : index
    %c0_0 = arith.constant 0 : index
    %0 = vector.load %arg1[%c0, %c0_0] : memref<13x128xbf16, #tpu.memory_space<vmem>>, vector<13x128xbf16>
    %c0_1 = arith.constant 0 : index
    %c0_2 = arith.constant 0 : index
    %1 = vector.load %arg2[%c0_1, %c0_2] : memref<32x13xbf16, #tpu.memory_space<vmem>>, vector<32x13xbf16>
    %cst = arith.constant dense<0.000000e+00> : vector<32x128xf32>
    %2 = tpu.matmul %1, %0, %cst {dimension_numbers = #tpu.dot_dimension_numbers<[1], [0], [0], [1], [0, 0, 1, 1], [], []>} : vector<32x13xbf16>, vector<13x128xbf16>, vector<32x128xf32> -> vector<32x128xf32>
    %c0_3 = arith.constant 0 : index
    %c0_4 = arith.constant 0 : index
    %3 = vector.load %arg3[%c0_3, %c0_4] : memref<32x1xf32, #tpu.memory_space<vmem>>, vector<32x1xf32>
    %4 = vector.broadcast %3 : vector<32x1xf32> to vector<32x128xf32>
    %5 = arith.addf %2, %4 : vector<32x128xf32>
    %6 = math.tanh %5 : vector<32x128xf32>
    %c0_5 = arith.constant 0 : index
    %c0_6 = arith.constant 0 : index
    %7 = vector.load %arg4[%c0_5, %c0_6] : memref<32x32xbf16, #tpu.memory_space<vmem>>, vector<32x32xbf16>
    %8 = arith.truncf %6 : vector<32x128xf32> to vector<32x128xbf16>
    %cst_7 = arith.constant dense<0.000000e+00> : vector<32x128xf32>
    %9 = tpu.matmul %7, %8, %cst_7 {dimension_numbers = #tpu.dot_dimension_numbers<[1], [0], [0], [1], [0, 0, 1, 1], [], []>} : vector<32x32xbf16>, vector<32x128xbf16>, vector<32x128xf32> -> vector<32x128xf32>
    %c0_8 = arith.constant 0 : index
    %c0_9 = arith.constant 0 : index
    %10 = vector.load %arg5[%c0_8, %c0_9] : memref<32x1xf32, #tpu.memory_space<vmem>>, vector<32x1xf32>
    %11 = vector.broadcast %10 : vector<32x1xf32> to vector<32x128xf32>
    %12 = arith.addf %9, %11 : vector<32x128xf32>
    %13 = math.tanh %12 : vector<32x128xf32>
    %c0_10 = arith.constant 0 : index
    %c0_11 = arith.constant 0 : index
    %14 = vector.load %arg6[%c0_10, %c0_11] : memref<10x32xbf16, #tpu.memory_space<vmem>>, vector<10x32xbf16>
    %15 = arith.truncf %13 : vector<32x128xf32> to vector<32x128xbf16>
    %cst_12 = arith.constant dense<0.000000e+00> : vector<10x128xf32>
    %16 = tpu.matmul %14, %15, %cst_12 {dimension_numbers = #tpu.dot_dimension_numbers<[1], [0], [0], [1], [0, 0, 1, 1], [], []>} : vector<10x32xbf16>, vector<32x128xbf16>, vector<10x128xf32> -> vector<10x128xf32>
    %c0_13 = arith.constant 0 : index
    %c0_14 = arith.constant 0 : index
    %17 = vector.load %arg7[%c0_13, %c0_14] : memref<10x1xf32, #tpu.memory_space<vmem>>, vector<10x1xf32>
    %18 = vector.broadcast %17 : vector<10x1xf32> to vector<10x128xf32>
    %19 = arith.addf %16, %18 : vector<10x128xf32>
    %c0_15 = arith.constant 0 : index
    %c0_16 = arith.constant 0 : index
    %20 = vector.load %arg8[%c0_15, %c0_16] : memref<10x128xf32, #tpu.memory_space<vmem>>, vector<10x128xf32>
    tpu.vector_store %arg8[%c0_15, %c0_16], %19 {strides = array<i32>} : memref<10x128xf32, #tpu.memory_space<vmem>>, vector<10x128xf32>,
    return
  }
  func.func @transform_0(%arg0: i32) -> (i32, i32) {
    %c0_i32 = arith.constant 0 : i32
    %c0_i32_0 = arith.constant 0 : i32
    return %c0_i32, %arg0 : i32, i32
  }
  func.func @transform_1(%arg0: i32) -> (i32, i32) {
    %c0_i32 = arith.constant 0 : i32
    %c0_i32_0 = arith.constant 0 : i32
    %c0_i32_1 = arith.constant 0 : i32
    return %c0_i32, %c0_i32_0 : i32, i32
  }
  func.func @transform_2(%arg0: i32) -> (i32, i32) {
    %c0_i32 = arith.constant 0 : i32
    %c0_i32_0 = arith.constant 0 : i32
    %c0_i32_1 = arith.constant 0 : i32
    return %c0_i32, %c0_i32_0 : i32, i32
  }
  func.func @transform_3(%arg0: i32) -> (i32, i32) {
    %c0_i32 = arith.constant 0 : i32
    %c0_i32_0 = arith.constant 0 : i32
    %c0_i32_1 = arith.constant 0 : i32
    return %c0_i32, %c0_i32_0 : i32, i32
  }
  func.func @transform_4(%arg0: i32) -> (i32, i32) {
    %c0_i32 = arith.constant 0 : i32
    %c0_i32_0 = arith.constant 0 : i32
    %c0_i32_1 = arith.constant 0 : i32
    return %c0_i32, %c0_i32_0 : i32, i32
  }
  func.func @transform_5(%arg0: i32) -> (i32, i32) {
    %c0_i32 = arith.constant 0 : i32
    %c0_i32_0 = arith.constant 0 : i32
    %c0_i32_1 = arith.constant 0 : i32
    return %c0_i32, %c0_i32_0 : i32, i32
  }
  func.func @transform_6(%arg0: i32) -> (i32, i32) {
    %c0_i32 = arith.constant 0 : i32
    %c0_i32_0 = arith.constant 0 : i32
    %c0_i32_1 = arith.constant 0 : i32
    return %c0_i32, %c0_i32_0 : i32, i32
  }
  func.func @transform_7(%arg0: i32) -> (i32, i32) {
    %c0_i32 = arith.constant 0 : i32
    %c0_i32_0 = arith.constant 0 : i32
    return %c0_i32, %arg0 : i32, i32
  }
}

</mosaic_0001>

<bundles_post_ra>
// kernel: tpu_custom_call.1
= control target key start
LH: loop header
LB: loop body
LE: loop exit
PB: predicated region body
PF: predicated region fallthrough
CT: control target
= control target key end

     0   :  { %12 = vsyncpa [#allocation4], 0  ;;  %s1079_s0 = inlined_call_operand.vmem [shape: bf16[13,384], index: 0, kind: input, shape index: {}]   ;;  %s1080_s1 = inlined_call_operand.vmem [shape: bf16[32,13], index: 1, kind: input, shape index: {}]   ;;  %s1081_s2 = inlined_call_operand.vmem [shape: f32[32,1], index: 2, kind: input, shape index: {}]   ;;  %s1082_s3 = inlined_call_operand.vmem [shape: bf16[32,32], index: 3, kind: input, shape index: {}]   ;;  %s1083_s4 = inlined_call_operand.vmem [shape: f32[32,1], index: 4, kind: input, shape index: {}]   ;;  %s1084_s5 = inlined_call_operand.vmem [shape: bf16[10,32], index: 5, kind: input, shape index: {}]   ;;  %s1085_s6 = inlined_call_operand.vmem [shape: f32[10,1], index: 6, kind: input, shape index: {}]   ;;  %s1086_s7 = inlined_call_operand.hbm [shape: f32[10,384], index: 7, kind: output, shape index: {}]  }
   0x1   :  { %14 = vsyncpa [#allocation4 + $0x1], 0  ;;  %s920_s24 = smov 0   ;;  %s922_s25 = smov 0  }
   0x2   :  { %s924_s26 = smov 0   ;;  %s926_s27 = smov 0  }
   0x3 LB: > { %s682_s28 = sadd.s32 4294967295, %s870_s27   ;;  %s683_s29 = sadd.s32 4294967294, %s870_s27   ;;  %s870_s27 = sphi %s926_s27, %s1092_s27   ;;  %s866_s26 = sphi %s924_s26, %s1091_s26   ;;  %s862_s25 = sphi %s922_s25, %s1090_s25   ;;  %s858_s24 = sphi %s920_s24, %s1089_s24  }
   0x4   : > { %s943_s30 = sadd.s32 1, %s870_s27   ;;  %s27_s8 = sadd.s32 1, %s866_s26 }
   0x5   : > { %s24_s9 = ssub.s32 %s870_s27, %s943_s30  ;;  %p34_p0 = scmp.ne.s32.totalorder %s866_s26, %s862_s25 }
   0x6   : > { %p25_p1 = scmp.eq.s32.totalorder %s24_s9, 0  ;;  %p35_p2 = scmp.eq.s32.totalorder %s870_s27, 0 }
   0x7   : > { %p190_p3 = scmp.eq.s32.totalorder %s682_s28, 2  ;;  %p195_p4 = scmp.ne.s32.totalorder %s862_s25, %s858_s24 }
   0x8   : > { %s956_s10 = scalar_select %p25_p1, %s866_s26, %s27_s8  }
   0x9   : > { %p36_p5 = por %p35_p2, %p34_p0  ;;  %p958_p6 = por %p190_p3, %p34_p0 }
   0xa   : > { %p196_p7 = scmp.eq.s32.totalorder %s683_s29, 2  ;;  %p685_p9 = scmp.ge.s32.totalorder %s870_s27, 3 }
   0xc   : > { %p962_p8 = por %p196_p7, %p195_p4  ;;  %230 = sbr.rel (%p685_p9) target bundleno = 26 (0x1a), region = 40 }
  0x13   : > { %233 = sbr.rel (!%p36_p5) target bundleno = 26 (0x1a), region = 44  ;;  %s235_s13 = sand.u32 (%p36_p5), 1, %s866_s26  }
  0x14   : > { %s687_s14 = sshll.u32 (%p36_p5), %s870_s27, 2  ;;  %s686_s15 = sshll.u32 (%p36_p5), %s235_s13, 3 }
  0x15   : > { %s239_s18 = scalar_lea.vmem (%p36_p5), %s1079_s0, %s687_s14  ;;  %s237_s19 = scalar_lea.vmem (%p36_p5), [#allocation2], %s686_s15 }
  0x16   : > { %v255_v0 = vld [vmem:[%s239_s18] sm:$0xf] (%p36_p5)  ;;  %v257_v1 = vld [vmem:[%s239_s18 + $0xc] sm:$0xf] (%p36_p5) }
  0x17   : > { %256 = vst [vmem:[%s237_s19] sm:$0xf] (%p36_p5), %v255_v0  ;;  %258 = vst [vmem:[%s237_s19 + $0x4] sm:$0xf] (%p36_p5), %v257_v1 }
  0x1a PF: > { %p688_p10 = scmp.ge.s32.totalorder %s870_s27, 1  ;;  %p284_p11 = scmp.lt.s32.totalorder %s870_s27, 4 }
  0x1c   : > { %p285_p12 = pnand %p688_p10, %p284_p11 }
  0x1d   : > { %s975_s20 = sand.u32 (!%p285_p12), 1, %s862_s25   ;;  %vm375_vm0 = vcmask (!%p285_p12), 1045504   ;;  %vm376_vm1 = vcmask (!%p285_p12), 1046528   ;;  %v872_v2 = vmov (!%p285_p12), 65535   ;;  %v787_v4 = vld [vmem:[%s1080_s1] sm:$0xff] (!%p285_p12)   ;;  %vm368_vm2 = vcmask (!%p285_p12), 105472  }
  0x1e   : > { %288 = sbr.rel (%p285_p12) target bundleno = 746 (0x2ea), region = 85  ;;  %s689_s21 = sshll.u32 (!%p285_p12), %s975_s20, 3  ;;  %v377_v3 = vsel (!%p285_p12), %vm375_vm0, 4294967295, %v872_v2  ;;  %718 = vmatprep.mubr.msk.bf16.mxu0 (!%p285_p12), %vm368_vm2, %v787_v4  ;;  %v329_v7 = vld [vmem:[%s1081_s2] sm:$0xff] (!%p285_p12)  ;;  %v331_v8 = vld [vmem:[%s1081_s2 + $0x10] sm:$0xff] (!%p285_p12)  ;;  %v873_v10 = vmov (!%p285_p12), 0  }
  0x1f   : > { %v378_v5 = vsel (!%p285_p12), %vm376_vm1, %v377_v3, 0  ;;  %s293_s29 = scalar_lea.vmem (!%p285_p12), [#allocation2], %s689_s21  ;;  %784 = vset.pattern.permute.xlu0 (!%p285_p12), %v873_v10  ;;  %785 = vset.pattern.permute.xlu1 (!%p285_p12), %v873_v10  ;;  %v788_v11 = vld [vmem:[%s1080_s1 + $0x8] sm:$0xff] (!%p285_p12)   ;;  %v332_v13 = vld [vmem:[%s1081_s2 + $0x18] sm:$0xff] (!%p285_p12)  ;;  %v441_v14 = vld [vmem:[%s1083_s4] sm:$0xff] (!%p285_p12)  ;;  %vm475_vm3 = vcmask (!%p285_p12), 261120  }
  0x20   : > { %v786_v6 = vld [vmem:[%s293_s29] sm:$0x7f] (!%p285_p12)   ;;  %335 = vperm.xlu0 (!%p285_p12), %784, %v329_v7   ;;  %345 = vperm.xlu1 (!%p285_p12), %785, %v331_v8   ;;  %v443_v16 = vld [vmem:[%s1083_s4 + $0x10] sm:$0xff] (!%p285_p12)  ;;  %v444_v17 = vld [vmem:[%s1083_s4 + $0x18] sm:$0xff] (!%p285_p12)  ;;  %v874_v40 = vmov (!%p285_p12), 0.0   ;;  %vm875_vm4 = vmmov (!%p285_p12), 0  }
  0x21   : > { %v380_v9 = vand.u32 (!%p285_p12), %v786_v6, %v378_v5  ;;  %v330_v12 = vld [vmem:[%s1081_s2 + $0x8] sm:$0xff] (!%p285_p12)  ;;  %v539_v18 = vld [vmem:[%s1085_s6] sm:$0xff] (!%p285_p12)  ;;  %s690_s13 = sshll.u32 (!%p285_p12), %s975_s20, 4  ;;  %s703_s16 = sshll.u32 (!%p285_p12), %s682_s28, 7 }
  0x22   : > { %v442_v15 = vld [vmem:[%s1083_s4 + $0x8] sm:$0xff] (!%p285_p12)  ;;  %v789_v20 = vld [vmem:[%s1082_s3] sm:$0xff] (!%p285_p12)   ;;  %s321_s14 = scalar_lea.vmem (!%p285_p12), [#allocation3], %s690_s13  ;;  %s1036_s19 = scalar_lea.hbm (!%p285_p12), %s1086_s7, %s703_s16 }
  0x23   : > { %716 = vmatprep.subr.bf16.mxu0 (!%p285_p12), %v380_v9  ;;  %v540_v19 = vld [vmem:[%s1085_s6 + $0x8] sm:$0x3] (!%p285_p12)  ;;  %726 = vmatprep.mubr.msk.bf16.mxu1 (!%p285_p12), %vm475_vm3, %v789_v20  ;;  %v791_v59 = vld [vmem:[%s1084_s5] sm:$0x1f] (!%p285_p12)   ;;  %s615_s15 = sshll.u32 (!%p285_p12), %s321_s14, 4  ;;  %s603_s28 = scalar_lea.sflag (!%p285_p12), [#allocation4], %s975_s20  ;;  %s1031_s15 = int_to_ptr.vmem [resolvable:$true] %s615_s15 }
  0x24   : > { %717 = vmatpush3.bf16.msra.mxu0 (!%p285_p12), %v380_v9  ;;  %340 = vperm.xlu0 (!%p285_p12), %784, %v330_v12   ;;  %v790_v39 = vld [vmem:[%s1082_s3 + $0x8] sm:$0xff] (!%p285_p12)   ;;  %s808_s21 = scalar_lea.vmem (!%p285_p12), %s1031_s15, 256  ;;  %s876_s22 = smov (!%p285_p12), [#allocation3]  }
  0x25   : > { %350 = vperm.xlu1 %785, %v332_v13   ;;  %730 = vmatprep.subr.bf16.mxu0 %v874_v40  ;;  %p809_p13 = scmp.ne.s32.totalorder %s1031_s15, %s808_s21  ;;  %s812_s23 = sshll.u32 %s876_s22, 4  ;;  %s813_s23 = int_to_ptr.vmem [resolvable:$false] %s812_s23 }
  0x26   : > { %s814_s29 = scalar_lea.vmem %s813_s23, 512  ;;  %p815_p2 = scmp.lt.s32.totalorder %s1031_s15, %s813_s23 }
  0x27   : > { %719 = vmatmul.mubr.msk.bf16.vlgmr.msra.gmra.mrb[0].mxu0 %vm368_vm2, %v788_v11  ;;  %p810_p0 = pnand %p809_p13, %p958_p6  ;;  %p816_p3 = scmp.lt.s32.totalorder %s814_s29, %s808_s21 }
  0x28   : > { %447 = vperm.xlu0 %784, %v441_v14   ;;  %734 = vmatprep.mubr.msk.bf16.mxu0 %vm875_vm4, %v874_v40 }
  0x29   : > { %452 = vperm.xlu1 %785, %v442_v15   ;;  %p811_p1 = pneg %p810_p0  ;;  %p817_p4 = por %p816_p3, %p815_p2 }
  0x2b   : > { %p818_p5 = pnand %p817_p4, %p811_p1 }
  0x2c   : > { %457 = vperm.xlu0 %784, %v443_v16  }
  0x2d   : > { %462 = vperm.xlu1 %785, %v444_v17  }
  0x30   : > { %543 = vperm.xlu0 %784, %v539_v18  }
  0x31   : > { %548 = vperm.xlu1 %785, %v540_v19  }
  0x9f   : > { %v346_v21 = vpop.permute.xlu1 %345  ;;  %v336_v22 = vpop.permute.xlu0 %335 }
  0xa3   : > { %v341_v29 = vpop.permute.xlu0 %340 }
  0xa4   : > { %v351_v26 = vpop.permute.xlu1 %350 }
  0xa7   : > { %v448_v41 = vpop.permute.xlu0 %447 }
  0xa8   : > { %v453_v42 = vpop.permute.xlu1 %452 }
  0xab   : > { %v458_v43 = vpop.permute.xlu0 %457 }
  0xac   : > { %v463_v47 = vpop.permute.xlu1 %462 }
  0xaf   : > { %v544_v60 = vpop.permute.xlu0 %543 }
  0xb0   : > { %v549_v0 = vpop.permute.xlu1 %548 }
  0xfa   : > { %v720_v23 = vpop.f32.mrb[0].mxu0 }
  0xfb   : > { %v425_v24 = vadd.f32 %v720_v23, %v346_v21  ;;  %v416_v25 = vpop.f32.mrb[1].mxu0 }
  0xfc   : > { %v417_v27 = vadd.f32 %v416_v25, %v336_v22  ;;  %v721_v28 = vpop.f32.mrb[2].mxu0 }
  0xfd   : > { %792 = vtanh.f32 %v425_v24  ;;  %v428_v30 = vadd.f32 %v721_v28, %v351_v26  ;;  %v419_v31 = vpop.f32.mrb[3].mxu0 }
  0xfe   : > { %794 = vtanh.f32 %v417_v27  ;;  %v420_v32 = vadd.f32 %v419_v31, %v341_v29 }
  0xff   : > { %796 = vtanh.f32 %v428_v30 }
 0x100   : > { %798 = vtanh.f32 %v420_v32 }
 0x107   : > { %v793_v33 = vpop.eup %792 }
 0x108   : > { %v795_v34 = vpop.eup %794 }
 0x109   : > { %v797_v35 = vpop.eup %796 }
 0x10a   : > { %v799_v36 = vpop.eup %798  ;;  %v440_v37 = vpack.c.bf16 %v797_v35, %v793_v33 }
 0x10b   : > { %v439_v38 = vpack.c.bf16 %v799_v36, %v795_v34 }
 0x10d   : > { %722 = vmatprep.subr.bf16.mxu1 %v439_v38 }
 0x10e   : > { %723 = vmatpush3.bf16.msra.mxu1 %v439_v38 }
 0x10f   : > { %724 = vmatprep.subr.bf16.mxu1 %v440_v37 }
 0x112   : > { %725 = vmatpush3.bf16.msra.mxu1 %v440_v37 }
 0x115   : > { %727 = vmatmul.mubr.msk.bf16.vlgmr.msra.gmra.mrb[0].mxu1 %vm475_vm3, %v790_v39 }
 0x1e8   : > { %v728_v44 = vpop.f32.mrb[0].mxu1 }
 0x1e9   : > { %v525_v45 = vadd.f32 %v728_v44, %v458_v43  ;;  %v516_v46 = vpop.f32.mrb[1].mxu1 }
 0x1ea   : > { %v517_v48 = vadd.f32 %v516_v46, %v448_v41  ;;  %v729_v49 = vpop.f32.mrb[2].mxu1 }
 0x1eb   : > { %800 = vtanh.f32 %v525_v45  ;;  %v528_v50 = vadd.f32 %v729_v49, %v463_v47  ;;  %v519_v51 = vpop.f32.mrb[3].mxu1 }
 0x1ec   : > { %802 = vtanh.f32 %v517_v48  ;;  %v520_v52 = vadd.f32 %v519_v51, %v453_v42 }
 0x1ed   : > { %804 = vtanh.f32 %v528_v50 }
 0x1ee   : > { %806 = vtanh.f32 %v520_v52 }
 0x1f5   : > { %v801_v53 = vpop.eup %800 }
 0x1f6   : > { %v803_v54 = vpop.eup %802 }
 0x1f7   : > { %v805_v55 = vpop.eup %804 }
 0x1f8   : > { %v807_v56 = vpop.eup %806  ;;  %v538_v57 = vpack.c.bf16 %v805_v55, %v801_v53 }
 0x1f9   : > { %v537_v58 = vpack.c.bf16 %v807_v56, %v803_v54 }
 0x1fb   : > { %731 = vmatpush3.bf16.msra.mxu0 %v537_v58 }
 0x1fc   : > { %732 = vmatprep.subr.bf16.mxu0 %v874_v40 }
 0x1ff   : > { %733 = vmatpush3.bf16.msra.mxu0 %v538_v57 }
 0x202   : > { %735 = vmatmul.mubr.msk.bf16.vlgmr.msra.gmra.mrb[4].mxu0 %vm475_vm3, %v791_v59 }
 0x2d5   : > { %v593_v61 = vpop.f32.mrb[4].mxu0 }
 0x2d6   : > { %v594_v62 = vadd.f32 %v593_v61, %v544_v60  ;;  %v736_v63 = vpop.f32.mrb[5].mxu0 }
 0x2d7   : > { %v596_v1 = vpop.f32.mrb[6].mxu0 }
 0x2d8   : > { %600 = vst [vmem:[%s321_s14] sm:$0xff] %v594_v62  ;;  %v597_v2 = vadd.f32 %v596_v1, %v549_v0  ;;  %v737_v3 = vpop.f32.mrb[7].mxu0 }
 0x2da   : > { %601 = vst [vmem:[%s321_s14 + $0x8] sm:$0x3] %v597_v2 }
 0x2db   : > { %821 = shalt.err (!%p818_p5)
}
 0x2dc   : > { %s822_s8 = scalar_lea.hbm %s1036_s19, 256  ;;  %s826_s14 = scalar_lea.hbm %s1086_s7, 768 }
 0x2dd   : > { %p823_p7 = scmp.ne.s32.totalorder %s1036_s19, %s822_s8  ;;  %p827_p11 = scmp.lt.u32.totalorder %s1036_s19, %s1086_s7 }
 0x2de   : > { %p828_p12 = scmp.lt.u32.totalorder %s826_s14, %s822_s8  ;;  %p830_p0 = scmp.lt.u32.totalorder %s822_s8, %s1036_s19 }
 0x2df   : > { %p824_p9 = pnand %p823_p7, %p958_p6 }
 0x2e0   : > { %p829_p13 = por %p828_p12, %p827_p11 }
 0x2e1   : > { %p825_p10 = pneg %p824_p9 }
 0x2e2   : > { %p831_p1 = por %p830_p0, %p829_p13 }
 0x2e4   : > { %p832_p2 = pnand %p831_p1, %p825_p10 }
 0x2e6   : > { %835 = shalt.err (!%p832_p2)
}
 0x2e7   : > { %s877_s18 = smov 128   ;;  %s878_s21 = smov 384  }
 0x2e8   : > { %s879_s22 = smov 8  }
 0x2e9   : > { %738 = dma.vmem_to_hbm [thread:$0]  (%p958_p6), %s1031_s15, 256, %s1036_s19, %s603_s28, %s877_s18, %s878_s21, %s879_s22  }
 0x2ea PF: > { %p744_p3 = scmp.ge.s32.totalorder %s870_s27, 2  ;;  %s630_s23 = sand.u32 1, %s858_s24  }
 0x2eb   : > { %s631_s29 = scalar_lea.sflag [#allocation4], %s630_s23 }
 0x2ec   : > { %p741_p4 = pnand %p744_p3, %p962_p8 }
 0x2ee   : > { %853 = dma.done.wait (!%p741_p4), %s631_s29, 256  }
 0x2ef   : > { %855 = vsyncadd (!%p741_p4), %s631_s29, 4294967040  ;;  %p17_p5 = scmp.ge.s32.totalorder %s943_s30, 5   ;;  %s1089_s24 = smov %s862_s25 }
 0x2f0   : > { %s1090_s25 = smov %s866_s26  ;;  %s1091_s26 = smov %s956_s10 }
 0x2f1   : > { %s1092_s27 = smov %s943_s30  ;;  %19 = sbr.rel (!%p17_p5) target bundleno = 3 (0x3), region = 129 }
 0x2f8   :  { %636 = vsyncpa [#allocation4], 1 }
 0x2f9   :  { %638 = vsyncpa [#allocation4 + $0x1], 1 }

</bundles_post_ra>
